<compile_context>
chip_gen: v7x
topology: tpu7x:2x2x1
jax: 0.10.0
libtpu: 0.0.40
codegen_flags: <defaults>
</compile_context>

<pallas_src>
import jax
import jax.numpy as jnp
from jax.experimental import pallas as pl
from jax.experimental.pallas import tpu as pltpu
import numpy as np

INPUT_SIZE = 4
HIDDEN_SIZE = 64


def _lstm_kernel(xf_ref, wbig_ref, whh_ref, b_ref, gfix_ref, h_out_ref, pre_ref):
    """Single-layer LSTM recurrence, final hidden state only.

    xf_ref   : (B, T*I)      VMEM  batch-first input, time/feature dims merged
    wbig_ref : (T*I, T*4H)   VMEM  blockdiag of W_ih^T (g columns pre-scaled x2)
    whh_ref  : (H, 4H)       VMEM  W_hh^T (g columns pre-scaled x2)
    b_ref    : (1, T*4H)     VMEM  (b_ih + b_hh) pre-scaled, tiled T times
    gfix_ref : (2, 4H)       VMEM  row0 = gate mul [1,1,2,1], row1 = add [0,0,-1,0]
    h_out    : (B, H)        VMEM  final hidden state
    pre_ref  : (B, T*4H)     VMEM  scratch: hoisted input projection + bias
    """
    B, H = h_out_ref.shape
    G = 4 * H
    T = pre_ref.shape[1] // G

    # Hoisted input projection + bias for ALL time steps: one MXU call and one
    # bias broadcast; nothing but the recurrent matmul stays on the serial path.
    pre_ref[...] = (
        jnp.dot(xf_ref[...], wbig_ref[...], preferred_element_type=jnp.float32)
        + b_ref[...]
    )

    # Full-width gate fixup vectors, broadcast hoisted out of the loop.
    g_mul = jnp.broadcast_to(gfix_ref[0:1, :], (B, G))
    g_add = jnp.broadcast_to(gfix_ref[1:2, :], (B, G))

    h = jnp.zeros((B, H), jnp.float32)
    c = jnp.zeros((B, H), jnp.float32)

    # T is small & static -> fully unrolled recurrence so the LLO scheduler can
    # overlap the MXU push/pop of step t with the VPU/EUP epilogue of step t-1.
    for t in range(T):
        # Only op on the serial critical path that touches the MXU.  whh is
        # streamed from VMEM each step instead of being pinned in vregs.
        gates = pre_ref[:, t * G:(t + 1) * G] + jnp.dot(
            h, whh_ref[...], preferred_element_type=jnp.float32)     # (B, 4H)
        # One full-width EUP sigmoid + one full-width VPU FMA; recovers
        # tanh on the g columns via tanh(z) = 2*sigmoid(2z) - 1.
        act = jax.nn.sigmoid(gates) * g_mul + g_add
        i_g = act[:, 0 * H:1 * H]
        f_g = act[:, 1 * H:2 * H]
        g_g = act[:, 2 * H:3 * H]
        o_g = act[:, 3 * H:4 * H]
        c = f_g * c + i_g * g_g
        h = o_g * jnp.tanh(c)

    h_out_ref[...] = h


def prepare_encoder_params(w_ih, w_hh, b_ih, b_hh, seq_len):
    """One-time (init-time) weight preprocessing.  Not part of the forward path."""
    H = w_hh.shape[1]
    I = w_ih.shape[1]
    T = int(seq_len)
    G = 4 * H

    # g-gate (cell input) pre-scale by 2 so tanh(z) = 2*sigmoid(2z) - 1.
    scale = jnp.concatenate([jnp.ones((2 * H,), jnp.float32),
                             jnp.full((H,), 2.0, jnp.float32),
                             jnp.ones((H,), jnp.float32)])
    wih_t = jnp.transpose(w_ih).astype(jnp.float32) * scale[None, :]   # (I, 4H)
    whh_t = jnp.transpose(w_hh).astype(jnp.float32) * scale[None, :]   # (H, 4H)
    bias = (b_ih + b_hh).astype(jnp.float32) * scale                   # (4H,)

    # Block-diagonal "all-steps" input-projection weight: column block t of
    # (x reshaped to (B, T*I)) @ w_big equals x[:, t, :] @ W_ih^T, so the whole
    # input projection is a single hoisted MXU call with zero wrapper copies.
    w_big = jnp.zeros((T * I, T * G), jnp.float32)
    for t in range(T):
        w_big = w_big.at[t * I:(t + 1) * I, t * G:(t + 1) * G].set(wih_t)
    b_big = jnp.tile(bias, (T,)).reshape(1, T * G)

    # Full-width gate fixup: act = sigmoid(gates) * mul + add.
    g_mul = jnp.concatenate([jnp.ones((2 * H,), jnp.float32),
                             jnp.full((H,), 2.0, jnp.float32),
                             jnp.ones((H,), jnp.float32)]).reshape(1, G)
    g_add = jnp.concatenate([jnp.zeros((2 * H,), jnp.float32),
                             jnp.full((H,), -1.0, jnp.float32),
                             jnp.zeros((H,), jnp.float32)]).reshape(1, G)
    gfix = jnp.concatenate([g_mul, g_add], axis=0)                     # (2, 4H)

    return (w_big, whh_t, b_big, gfix)


@jax.jit
def encoder_forward(x, params):
    """x: (B, T, I) float32 (batch_first, like nn.LSTM) -> (B, H) final hidden."""
    w_big, whh_t, b_big, gfix = params
    B, T, I = x.shape
    H = whh_t.shape[0]
    G = 4 * H
    # Cheap insurance: params must have been prepared for this (T, I).
    assert w_big.shape == (T * I, T * G), (
        "prepare_encoder_params was built for a different seq_len/input_size")

    # Minor-dim merge only: no transpose, no pad, no HBM round-trip before the kernel.
    xf = x.astype(jnp.float32).reshape(B, T * I)

    vmem = pl.BlockSpec(memory_space=pltpu.MemorySpace.VMEM)
    h_out = pl.pallas_call(
        _lstm_kernel,
        out_shape=jax.ShapeDtypeStruct((B, H), jnp.float32),
        in_specs=[vmem, vmem, vmem, vmem, vmem],
        out_specs=vmem,
        scratch_shapes=[pltpu.VMEM((B, T * G), jnp.float32)],
    )(xf, w_big, whh_t, b_big, gfix)
    return h_out


def _reference_lstm(x, w_ih, w_hh, b_ih, b_hh):
    """Pure-numpy reference matching torch.nn.LSTM (single layer, batch_first)."""
    x = np.asarray(x, np.float32)
    B, T, I = x.shape
    H = w_hh.shape[1]
    h = np.zeros((B, H), np.float32)
    c = np.zeros((B, H), np.float32)

    def sig(z):
        return 1.0 / (1.0 + np.exp(-z))

    for t in range(T):
        gates = x[:, t, :] @ w_ih.T + h @ w_hh.T + b_ih + b_hh
        i = sig(gates[:, 0 * H:1 * H])
        f = sig(gates[:, 1 * H:2 * H])
        g = np.tanh(gates[:, 2 * H:3 * H])
        o = sig(gates[:, 3 * H:4 * H])
        c = f * c + i * g
        h = o * np.tanh(c)
    return h


if __name__ == "__main__":
    B, T, I, H = 2, 8, INPUT_SIZE, HIDDEN_SIZE

    key = jax.random.PRNGKey(0)
    k_x, k_wih, k_whh, k_bih, k_bhh = jax.random.split(key, 5)

    # Deterministic PyTorch-style init: U(-1/sqrt(H), 1/sqrt(H))
    bound = 1.0 / np.sqrt(H)
    w_ih = jax.random.uniform(k_wih, (4 * H, I), jnp.float32, -bound, bound)
    w_hh = jax.random.uniform(k_whh, (4 * H, H), jnp.float32, -bound, bound)
    b_ih = jax.random.uniform(k_bih, (4 * H,), jnp.float32, -bound, bound)
    b_hh = jax.random.uniform(k_bhh, (4 * H,), jnp.float32, -bound, bound)

    x = jax.random.normal(k_x, (B, T, I), jnp.float32)

    # One-time weight preprocessing (init-time, outside the forward path).
    params = prepare_encoder_params(w_ih, w_hh, b_ih, b_hh, seq_len=T)

    out = encoder_forward(x, params)
    out = jax.block_until_ready(out)

    ref = _reference_lstm(np.asarray(x), np.asarray(w_ih), np.asarray(w_hh),
                          np.asarray(b_ih), np.asarray(b_hh))
    np.testing.assert_allclose(np.asarray(out), ref, rtol=1e-4, atol=1e-5)

    print("KERNEL_OK")
</pallas_src>

<mosaic_0001>
module attributes {stable_mosaic.version = 11 : i64} {
  func.func @_lstm_kernel(%arg0: memref<2x32xf32, #tpu.memory_space<vmem>>, %arg1: memref<32x2048xf32, #tpu.memory_space<vmem>>, %arg2: memref<64x256xf32, #tpu.memory_space<vmem>>, %arg3: memref<1x2048xf32, #tpu.memory_space<vmem>>, %arg4: memref<2x256xf32, #tpu.memory_space<vmem>>, %arg5: memref<2x64xf32, #tpu.memory_space<vmem>>, %arg6: memref<2x2048xf32, #tpu.memory_space<vmem>>) attributes {dimension_semantics = [], scalar_prefetch = 0 : i64, scratch_operands = 1 : i64, tpu.core_type = #tpu.core_type<tc>} {
    %c0 = arith.constant 0 : index
    %c0_0 = arith.constant 0 : index
    %0 = vector.load %arg0[%c0, %c0_0] : memref<2x32xf32, #tpu.memory_space<vmem>>, vector<2x32xf32>
    %c0_1 = arith.constant 0 : index
    %c0_2 = arith.constant 0 : index
    %1 = vector.load %arg1[%c0_1, %c0_2] : memref<32x2048xf32, #tpu.memory_space<vmem>>, vector<32x2048xf32>
    %cst = arith.constant dense<0.000000e+00> : vector<2x2048xf32>
    %2 = tpu.matmul %0, %1, %cst {dimension_numbers = #tpu.dot_dimension_numbers<[1], [0], [0], [1], [0, 0, 1, 1], [], []>} : vector<2x32xf32>, vector<32x2048xf32>, vector<2x2048xf32> -> vector<2x2048xf32>
    %c0_3 = arith.constant 0 : index
    %c0_4 = arith.constant 0 : index
    %3 = vector.load %arg3[%c0_3, %c0_4] : memref<1x2048xf32, #tpu.memory_space<vmem>>, vector<1x2048xf32>
    %4 = vector.broadcast %3 : vector<1x2048xf32> to vector<2x2048xf32>
    %5 = arith.addf %2, %4 : vector<2x2048xf32>
    %c0_5 = arith.constant 0 : index
    %c0_6 = arith.constant 0 : index
    %6 = vector.load %arg6[%c0_5, %c0_6] : memref<2x2048xf32, #tpu.memory_space<vmem>>, vector<2x2048xf32>
    tpu.vector_store %arg6[%c0_5, %c0_6], %5 {strides = array<i32>} : memref<2x2048xf32, #tpu.memory_space<vmem>>, vector<2x2048xf32>,
    %c0_7 = arith.constant 0 : index
    %c0_8 = arith.constant 0 : index
    %7 = vector.load %arg4[%c0_7, %c0_8] : memref<2x256xf32, #tpu.memory_space<vmem>>, vector<1x256xf32>
    %8 = vector.shape_cast %7 : vector<1x256xf32> to vector<1x256xf32>
    %9 = vector.broadcast %8 : vector<1x256xf32> to vector<2x256xf32>
    %c1 = arith.constant 1 : index
    %c0_9 = arith.constant 0 : index
    %10 = vector.load %arg4[%c1, %c0_9] : memref<2x256xf32, #tpu.memory_space<vmem>>, vector<1x256xf32>
    %11 = vector.shape_cast %10 : vector<1x256xf32> to vector<1x256xf32>
    %12 = vector.broadcast %11 : vector<1x256xf32> to vector<2x256xf32>
    %cst_10 = arith.constant 0.000000e+00 : f32
    %13 = vector.broadcast %cst_10 : f32 to vector<2x64xf32>
    %cst_11 = arith.constant 0.000000e+00 : f32
    %14 = vector.broadcast %cst_11 : f32 to vector<2x64xf32>
    %c0_12 = arith.constant 0 : index
    %c0_13 = arith.constant 0 : index
    %15 = vector.load %arg6[%c0_12, %c0_13] : memref<2x2048xf32, #tpu.memory_space<vmem>>, vector<2x256xf32>
    %c0_14 = arith.constant 0 : index
    %c0_15 = arith.constant 0 : index
    %16 = vector.load %arg2[%c0_14, %c0_15] : memref<64x256xf32, #tpu.memory_space<vmem>>, vector<64x256xf32>
    %cst_16 = arith.constant dense<0.000000e+00> : vector<2x256xf32>
    %17 = tpu.matmul %13, %16, %cst_16 {dimension_numbers = #tpu.dot_dimension_numbers<[1], [0], [0], [1], [0, 0, 1, 1], [], []>} : vector<2x64xf32>, vector<64x256xf32>, vector<2x256xf32> -> vector<2x256xf32>
    %18 = arith.addf %15, %17 : vector<2x256xf32>
    %19 = arith.negf %18 : vector<2x256xf32>
    %20 = math.exp %19 : vector<2x256xf32>
    %cst_17 = arith.constant 1.000000e+00 : f32
    %21 = vector.broadcast %cst_17 : f32 to vector<2x256xf32>
    %22 = arith.addf %21, %20 : vector<2x256xf32>
    %23 = arith.divf %21, %22 : vector<2x256xf32>
    %24 = arith.mulf %23, %9 : vector<2x256xf32>
    %25 = arith.addf %24, %12 : vector<2x256xf32>
    %26 = vector.extract_strided_slice %25 {offsets = [0, 0], sizes = [2, 64], strides = [1, 1]} : vector<2x256xf32> to vector<2x64xf32>
    %27 = vector.extract_strided_slice %25 {offsets = [0, 64], sizes = [2, 64], strides = [1, 1]} : vector<2x256xf32> to vector<2x64xf32>
    %28 = vector.extract_strided_slice %25 {offsets = [0, 128], sizes = [2, 64], strides = [1, 1]} : vector<2x256xf32> to vector<2x64xf32>
    %29 = vector.extract_strided_slice %25 {offsets = [0, 192], sizes = [2, 64], strides = [1, 1]} : vector<2x256xf32> to vector<2x64xf32>
    %30 = arith.mulf %27, %14 : vector<2x64xf32>
    %31 = arith.mulf %26, %28 : vector<2x64xf32>
    %32 = arith.addf %30, %31 : vector<2x64xf32>
    %33 = math.tanh %32 : vector<2x64xf32>
    %34 = arith.mulf %29, %33 : vector<2x64xf32>
    %c0_18 = arith.constant 0 : index
    %c256 = arith.constant 256 : index
    %35 = vector.load %arg6[%c0_18, %c256] : memref<2x2048xf32, #tpu.memory_space<vmem>>, vector<2x256xf32>
    %c0_19 = arith.constant 0 : index
    %c0_20 = arith.constant 0 : index
    %36 = vector.load %arg2[%c0_19, %c0_20] : memref<64x256xf32, #tpu.memory_space<vmem>>, vector<64x256xf32>
    %cst_21 = arith.constant dense<0.000000e+00> : vector<2x256xf32>
    %37 = tpu.matmul %34, %36, %cst_21 {dimension_numbers = #tpu.dot_dimension_numbers<[1], [0], [0], [1], [0, 0, 1, 1], [], []>} : vector<2x64xf32>, vector<64x256xf32>, vector<2x256xf32> -> vector<2x256xf32>
    %38 = arith.addf %35, %37 : vector<2x256xf32>
    %39 = arith.negf %38 : vector<2x256xf32>
    %40 = math.exp %39 : vector<2x256xf32>
    %cst_22 = arith.constant 1.000000e+00 : f32
    %41 = vector.broadcast %cst_22 : f32 to vector<2x256xf32>
    %42 = arith.addf %41, %40 : vector<2x256xf32>
    %43 = arith.divf %41, %42 : vector<2x256xf32>
    %44 = arith.mulf %43, %9 : vector<2x256xf32>
    %45 = arith.addf %44, %12 : vector<2x256xf32>
    %46 = vector.extract_strided_slice %45 {offsets = [0, 0], sizes = [2, 64], strides = [1, 1]} : vector<2x256xf32> to vector<2x64xf32>
    %47 = vector.extract_strided_slice %45 {offsets = [0, 64], sizes = [2, 64], strides = [1, 1]} : vector<2x256xf32> to vector<2x64xf32>
    %48 = vector.extract_strided_slice %45 {offsets = [0, 128], sizes = [2, 64], strides = [1, 1]} : vector<2x256xf32> to vector<2x64xf32>
    %49 = vector.extract_strided_slice %45 {offsets = [0, 192], sizes = [2, 64], strides = [1, 1]} : vector<2x256xf32> to vector<2x64xf32>
    %50 = arith.mulf %47, %32 : vector<2x64xf32>
    %51 = arith.mulf %46, %48 : vector<2x64xf32>
    %52 = arith.addf %50, %51 : vector<2x64xf32>
    %53 = math.tanh %52 : vector<2x64xf32>
    %54 = arith.mulf %49, %53 : vector<2x64xf32>
    %c0_23 = arith.constant 0 : index
    %c512 = arith.constant 512 : index
    %55 = vector.load %arg6[%c0_23, %c512] : memref<2x2048xf32, #tpu.memory_space<vmem>>, vector<2x256xf32>
    %c0_24 = arith.constant 0 : index
    %c0_25 = arith.constant 0 : index
    %56 = vector.load %arg2[%c0_24, %c0_25] : memref<64x256xf32, #tpu.memory_space<vmem>>, vector<64x256xf32>
    %cst_26 = arith.constant dense<0.000000e+00> : vector<2x256xf32>
    %57 = tpu.matmul %54, %56, %cst_26 {dimension_numbers = #tpu.dot_dimension_numbers<[1], [0], [0], [1], [0, 0, 1, 1], [], []>} : vector<2x64xf32>, vector<64x256xf32>, vector<2x256xf32> -> vector<2x256xf32>
    %58 = arith.addf %55, %57 : vector<2x256xf32>
    %59 = arith.negf %58 : vector<2x256xf32>
    %60 = math.exp %59 : vector<2x256xf32>
    %cst_27 = arith.constant 1.000000e+00 : f32
    %61 = vector.broadcast %cst_27 : f32 to vector<2x256xf32>
    %62 = arith.addf %61, %60 : vector<2x256xf32>
    %63 = arith.divf %61, %62 : vector<2x256xf32>
    %64 = arith.mulf %63, %9 : vector<2x256xf32>
    %65 = arith.addf %64, %12 : vector<2x256xf32>
    %66 = vector.extract_strided_slice %65 {offsets = [0, 0], sizes = [2, 64], strides = [1, 1]} : vector<2x256xf32> to vector<2x64xf32>
    %67 = vector.extract_strided_slice %65 {offsets = [0, 64], sizes = [2, 64], strides = [1, 1]} : vector<2x256xf32> to vector<2x64xf32>
    %68 = vector.extract_strided_slice %65 {offsets = [0, 128], sizes = [2, 64], strides = [1, 1]} : vector<2x256xf32> to vector<2x64xf32>
    %69 = vector.extract_strided_slice %65 {offsets = [0, 192], sizes = [2, 64], strides = [1, 1]} : vector<2x256xf32> to vector<2x64xf32>
    %70 = arith.mulf %67, %52 : vector<2x64xf32>
    %71 = arith.mulf %66, %68 : vector<2x64xf32>
    %72 = arith.addf %70, %71 : vector<2x64xf32>
    %73 = math.tanh %72 : vector<2x64xf32>
    %74 = arith.mulf %69, %73 : vector<2x64xf32>
    %c0_28 = arith.constant 0 : index
    %c768 = arith.constant 768 : index
    %75 = vector.load %arg6[%c0_28, %c768] : memref<2x2048xf32, #tpu.memory_space<vmem>>, vector<2x256xf32>
    %c0_29 = arith.constant 0 : index
    %c0_30 = arith.constant 0 : index
    %76 = vector.load %arg2[%c0_29, %c0_30] : memref<64x256xf32, #tpu.memory_space<vmem>>, vector<64x256xf32>
    %cst_31 = arith.constant dense<0.000000e+00> : vector<2x256xf32>
    %77 = tpu.matmul %74, %76, %cst_31 {dimension_numbers = #tpu.dot_dimension_numbers<[1], [0], [0], [1], [0, 0, 1, 1], [], []>} : vector<2x64xf32>, vector<64x256xf32>, vector<2x256xf32> -> vector<2x256xf32>
    %78 = arith.addf %75, %77 : vector<2x256xf32>
    %79 = arith.negf %78 : vector<2x256xf32>
    %80 = math.exp %79 : vector<2x256xf32>
    %cst_32 = arith.constant 1.000000e+00 : f32
    %81 = vector.broadcast %cst_32 : f32 to vector<2x256xf32>
    %82 = arith.addf %81, %80 : vector<2x256xf32>
    %83 = arith.divf %81, %82 : vector<2x256xf32>
    %84 = arith.mulf %83, %9 : vector<2x256xf32>
    %85 = arith.addf %84, %12 : vector<2x256xf32>
    %86 = vector.extract_strided_slice %85 {offsets = [0, 0], sizes = [2, 64], strides = [1, 1]} : vector<2x256xf32> to vector<2x64xf32>
    %87 = vector.extract_strided_slice %85 {offsets = [0, 64], sizes = [2, 64], strides = [1, 1]} : vector<2x256xf32> to vector<2x64xf32>
    %88 = vector.extract_strided_slice %85 {offsets = [0, 128], sizes = [2, 64], strides = [1, 1]} : vector<2x256xf32> to vector<2x64xf32>
    %89 = vector.extract_strided_slice %85 {offsets = [0, 192], sizes = [2, 64], strides = [1, 1]} : vector<2x256xf32> to vector<2x64xf32>
    %90 = arith.mulf %87, %72 : vector<2x64xf32>
    %91 = arith.mulf %86, %88 : vector<2x64xf32>
    %92 = arith.addf %90, %91 : vector<2x64xf32>
    %93 = math.tanh %92 : vector<2x64xf32>
    %94 = arith.mulf %89, %93 : vector<2x64xf32>
    %c0_33 = arith.constant 0 : index
    %c1024 = arith.constant 1024 : index
    %95 = vector.load %arg6[%c0_33, %c1024] : memref<2x2048xf32, #tpu.memory_space<vmem>>, vector<2x256xf32>
    %c0_34 = arith.constant 0 : index
    %c0_35 = arith.constant 0 : index
    %96 = vector.load %arg2[%c0_34, %c0_35] : memref<64x256xf32, #tpu.memory_space<vmem>>, vector<64x256xf32>
    %cst_36 = arith.constant dense<0.000000e+00> : vector<2x256xf32>
    %97 = tpu.matmul %94, %96, %cst_36 {dimension_numbers = #tpu.dot_dimension_numbers<[1], [0], [0], [1], [0, 0, 1, 1], [], []>} : vector<2x64xf32>, vector<64x256xf32>, vector<2x256xf32> -> vector<2x256xf32>
    %98 = arith.addf %95, %97 : vector<2x256xf32>
    %99 = arith.negf %98 : vector<2x256xf32>
    %100 = math.exp %99 : vector<2x256xf32>
    %cst_37 = arith.constant 1.000000e+00 : f32
    %101 = vector.broadcast %cst_37 : f32 to vector<2x256xf32>
    %102 = arith.addf %101, %100 : vector<2x256xf32>
    %103 = arith.divf %101, %102 : vector<2x256xf32>
    %104 = arith.mulf %103, %9 : vector<2x256xf32>
    %105 = arith.addf %104, %12 : vector<2x256xf32>
    %106 = vector.extract_strided_slice %105 {offsets = [0, 0], sizes = [2, 64], strides = [1, 1]} : vector<2x256xf32> to vector<2x64xf32>
    %107 = vector.extract_strided_slice %105 {offsets = [0, 64], sizes = [2, 64], strides = [1, 1]} : vector<2x256xf32> to vector<2x64xf32>
    %108 = vector.extract_strided_slice %105 {offsets = [0, 128], sizes = [2, 64], strides = [1, 1]} : vector<2x256xf32> to vector<2x64xf32>
    %109 = vector.extract_strided_slice %105 {offsets = [0, 192], sizes = [2, 64], strides = [1, 1]} : vector<2x256xf32> to vector<2x64xf32>
    %110 = arith.mulf %107, %92 : vector<2x64xf32>
    %111 = arith.mulf %106, %108 : vector<2x64xf32>
    %112 = arith.addf %110, %111 : vector<2x64xf32>
    %113 = math.tanh %112 : vector<2x64xf32>
    %114 = arith.mulf %109, %113 : vector<2x64xf32>
    %c0_38 = arith.constant 0 : index
    %c1280 = arith.constant 1280 : index
    %115 = vector.load %arg6[%c0_38, %c1280] : memref<2x2048xf32, #tpu.memory_space<vmem>>, vector<2x256xf32>
    %c0_39 = arith.constant 0 : index
    %c0_40 = arith.constant 0 : index
    %116 = vector.load %arg2[%c0_39, %c0_40] : memref<64x256xf32, #tpu.memory_space<vmem>>, vector<64x256xf32>
    %cst_41 = arith.constant dense<0.000000e+00> : vector<2x256xf32>
    %117 = tpu.matmul %114, %116, %cst_41 {dimension_numbers = #tpu.dot_dimension_numbers<[1], [0], [0], [1], [0, 0, 1, 1], [], []>} : vector<2x64xf32>, vector<64x256xf32>, vector<2x256xf32> -> vector<2x256xf32>
    %118 = arith.addf %115, %117 : vector<2x256xf32>
    %119 = arith.negf %118 : vector<2x256xf32>
    %120 = math.exp %119 : vector<2x256xf32>
    %cst_42 = arith.constant 1.000000e+00 : f32
    %121 = vector.broadcast %cst_42 : f32 to vector<2x256xf32>
    %122 = arith.addf %121, %120 : vector<2x256xf32>
    %123 = arith.divf %121, %122 : vector<2x256xf32>
    %124 = arith.mulf %123, %9 : vector<2x256xf32>
    %125 = arith.addf %124, %12 : vector<2x256xf32>
    %126 = vector.extract_strided_slice %125 {offsets = [0, 0], sizes = [2, 64], strides = [1, 1]} : vector<2x256xf32> to vector<2x64xf32>
    %127 = vector.extract_strided_slice %125 {offsets = [0, 64], sizes = [2, 64], strides = [1, 1]} : vector<2x256xf32> to vector<2x64xf32>
    %128 = vector.extract_strided_slice %125 {offsets = [0, 128], sizes = [2, 64], strides = [1, 1]} : vector<2x256xf32> to vector<2x64xf32>
    %129 = vector.extract_strided_slice %125 {offsets = [0, 192], sizes = [2, 64], strides = [1, 1]} : vector<2x256xf32> to vector<2x64xf32>
    %130 = arith.mulf %127, %112 : vector<2x64xf32>
    %131 = arith.mulf %126, %128 : vector<2x64xf32>
    %132 = arith.addf %130, %131 : vector<2x64xf32>
    %133 = math.tanh %132 : vector<2x64xf32>
    %134 = arith.mulf %129, %133 : vector<2x64xf32>
    %c0_43 = arith.constant 0 : index
    %c1536 = arith.constant 1536 : index
    %135 = vector.load %arg6[%c0_43, %c1536] : memref<2x2048xf32, #tpu.memory_space<vmem>>, vector<2x256xf32>
    %c0_44 = arith.constant 0 : index
    %c0_45 = arith.constant 0 : index
    %136 = vector.load %arg2[%c0_44, %c0_45] : memref<64x256xf32, #tpu.memory_space<vmem>>, vector<64x256xf32>
    %cst_46 = arith.constant dense<0.000000e+00> : vector<2x256xf32>
    %137 = tpu.matmul %134, %136, %cst_46 {dimension_numbers = #tpu.dot_dimension_numbers<[1], [0], [0], [1], [0, 0, 1, 1], [], []>} : vector<2x64xf32>, vector<64x256xf32>, vector<2x256xf32> -> vector<2x256xf32>
    %138 = arith.addf %135, %137 : vector<2x256xf32>
    %139 = arith.negf %138 : vector<2x256xf32>
    %140 = math.exp %139 : vector<2x256xf32>
    %cst_47 = arith.constant 1.000000e+00 : f32
    %141 = vector.broadcast %cst_47 : f32 to vector<2x256xf32>
    %142 = arith.addf %141, %140 : vector<2x256xf32>
    %143 = arith.divf %141, %142 : vector<2x256xf32>
    %144 = arith.mulf %143, %9 : vector<2x256xf32>
    %145 = arith.addf %144, %12 : vector<2x256xf32>
    %146 = vector.extract_strided_slice %145 {offsets = [0, 0], sizes = [2, 64], strides = [1, 1]} : vector<2x256xf32> to vector<2x64xf32>
    %147 = vector.extract_strided_slice %145 {offsets = [0, 64], sizes = [2, 64], strides = [1, 1]} : vector<2x256xf32> to vector<2x64xf32>
    %148 = vector.extract_strided_slice %145 {offsets = [0, 128], sizes = [2, 64], strides = [1, 1]} : vector<2x256xf32> to vector<2x64xf32>
    %149 = vector.extract_strided_slice %145 {offsets = [0, 192], sizes = [2, 64], strides = [1, 1]} : vector<2x256xf32> to vector<2x64xf32>
    %150 = arith.mulf %147, %132 : vector<2x64xf32>
    %151 = arith.mulf %146, %148 : vector<2x64xf32>
    %152 = arith.addf %150, %151 : vector<2x64xf32>
    %153 = math.tanh %152 : vector<2x64xf32>
    %154 = arith.mulf %149, %153 : vector<2x64xf32>
    %c0_48 = arith.constant 0 : index
    %c1792 = arith.constant 1792 : index
    %155 = vector.load %arg6[%c0_48, %c1792] : memref<2x2048xf32, #tpu.memory_space<vmem>>, vector<2x256xf32>
    %c0_49 = arith.constant 0 : index
    %c0_50 = arith.constant 0 : index
    %156 = vector.load %arg2[%c0_49, %c0_50] : memref<64x256xf32, #tpu.memory_space<vmem>>, vector<64x256xf32>
    %cst_51 = arith.constant dense<0.000000e+00> : vector<2x256xf32>
    %157 = tpu.matmul %154, %156, %cst_51 {dimension_numbers = #tpu.dot_dimension_numbers<[1], [0], [0], [1], [0, 0, 1, 1], [], []>} : vector<2x64xf32>, vector<64x256xf32>, vector<2x256xf32> -> vector<2x256xf32>
    %158 = arith.addf %155, %157 : vector<2x256xf32>
    %159 = arith.negf %158 : vector<2x256xf32>
    %160 = math.exp %159 : vector<2x256xf32>
    %cst_52 = arith.constant 1.000000e+00 : f32
    %161 = vector.broadcast %cst_52 : f32 to vector<2x256xf32>
    %162 = arith.addf %161, %160 : vector<2x256xf32>
    %163 = arith.divf %161, %162 : vector<2x256xf32>
    %164 = arith.mulf %163, %9 : vector<2x256xf32>
    %165 = arith.addf %164, %12 : vector<2x256xf32>
    %166 = vector.extract_strided_slice %165 {offsets = [0, 0], sizes = [2, 64], strides = [1, 1]} : vector<2x256xf32> to vector<2x64xf32>
    %167 = vector.extract_strided_slice %165 {offsets = [0, 64], sizes = [2, 64], strides = [1, 1]} : vector<2x256xf32> to vector<2x64xf32>
    %168 = vector.extract_strided_slice %165 {offsets = [0, 128], sizes = [2, 64], strides = [1, 1]} : vector<2x256xf32> to vector<2x64xf32>
    %169 = vector.extract_strided_slice %165 {offsets = [0, 192], sizes = [2, 64], strides = [1, 1]} : vector<2x256xf32> to vector<2x64xf32>
    %170 = arith.mulf %167, %152 : vector<2x64xf32>
    %171 = arith.mulf %166, %168 : vector<2x64xf32>
    %172 = arith.addf %170, %171 : vector<2x64xf32>
    %173 = math.tanh %172 : vector<2x64xf32>
    %174 = arith.mulf %169, %173 : vector<2x64xf32>
    %c0_53 = arith.constant 0 : index
    %c0_54 = arith.constant 0 : index
    %175 = vector.load %arg5[%c0_53, %c0_54] : memref<2x64xf32, #tpu.memory_space<vmem>>, vector<2x64xf32>
    tpu.vector_store %arg5[%c0_53, %c0_54], %174 {strides = array<i32>} : memref<2x64xf32, #tpu.memory_space<vmem>>, vector<2x64xf32>,
    return
  }
}

</mosaic_0001>

<bundles_post_ra>
// kernel: encoder_forward.1
= control target key start
LH: loop header
LB: loop body
LE: loop exit
PB: predicated region body
PF: predicated region fallthrough
CT: control target
= control target key end

     0   :  { %10 = vsyncpa [#allocation4], 0  ;;  %s2502_s0 = inlined_call_operand.vmem [shape: f32[2,32], index: 0, kind: input, shape index: {}]   ;;  %s2503_s1 = inlined_call_operand.hbm [shape: f32[32,2048], index: 1, kind: input, shape index: {}]   ;;  %s2504_s2 = inlined_call_operand.hbm [shape: f32[64,256], index: 2, kind: input, shape index: {}]   ;;  %s2505_s3 = inlined_call_operand.vmem [shape: f32[1,2048], index: 3, kind: input, shape index: {}]   ;;  %s2506_s4 = inlined_call_operand.vmem [shape: f32[2,256], index: 4, kind: input, shape index: {}]   ;;  %s2507_s5 = inlined_call_operand.hbm [shape: f32[2,64], index: 5, kind: output, shape index: {}]  }
   0x1   :  { %11 = vsyncpa [#allocation7], 0 }
   0x2   :  { %12 = vsyncpa [#allocation5], 0  ;;  %s2202_s18 = smov [#allocation3]   ;;  %s2130_s22 = scalar_lea.hbm %s2503_s1, 8192 }
   0x3   :  { %s20_s19 = sshll.u32 %s2202_s18, 4  ;;  %p2131_p0 = scmp.ne.s32.totalorder %s2503_s1, %s2130_s22  ;;  %s21_s19 = int_to_ptr.vmem [resolvable:$true] %s20_s19 }
   0x4   :  { %p2134_p1 = scmp.lt.u32.totalorder %s2130_s22, %s2503_s1 }
   0x6   :  { %p2136_p2 = pnand %p2134_p1, %p2131_p0 }
   0x8   :  { %2139 = shalt.err (!%p2136_p2)
}
   0x9   :  { %s2140_s27 = scalar_lea.vmem %s21_s19, 8192  ;;  %p2145_p4 = scmp.lt.s32.totalorder %s21_s19, %s21_s19 }
   0xa   :  { %p2141_p3 = scmp.ne.s32.totalorder %s21_s19, %s2140_s27  ;;  %p2146_p5 = scmp.lt.s32.totalorder %s2140_s27, %s2140_s27 }
   0xc   :  { %p2147_p6 = por %p2146_p5, %p2145_p4 }
   0xe   :  { %p2148_p7 = pnand %p2147_p6, %p2141_p3 }
  0x10   :  { %2151 = shalt.err (!%p2148_p7)
}
  0x11   :  { %s2203_s28 = smov 2048   ;;  %s2204_s29 = smov 128  }
  0x12   :  { %26 = dma.hbm_to_vmem [thread:$0]  %s2503_s1, 8192, %s21_s19, [#allocation4], %s2203_s28, %s2203_s28, %s2204_s29  }
  0x13   :  { %s2205_s7 = smov [#allocation6]   ;;  %s2152_s11 = scalar_lea.hbm %s2504_s2, 2048 }
  0x14   :  { %s32_s8 = sshll.u32 %s2205_s7, 4  ;;  %p2153_p8 = scmp.ne.s32.totalorder %s2504_s2, %s2152_s11  ;;  %s33_s8 = int_to_ptr.vmem [resolvable:$true] %s32_s8 }
  0x15   :  { %p2156_p9 = scmp.lt.u32.totalorder %s2152_s11, %s2504_s2 }
  0x17   :  { %p2158_p10 = pnand %p2156_p9, %p2153_p8 }
  0x19   :  { %2161 = shalt.err (!%p2158_p10)
}
  0x1a   :  { %s2162_s16 = scalar_lea.vmem %s33_s8, 2048  ;;  %p2167_p12 = scmp.lt.s32.totalorder %s33_s8, %s33_s8 }
  0x1b   :  { %p2163_p11 = scmp.ne.s32.totalorder %s33_s8, %s2162_s16  ;;  %p2168_p13 = scmp.lt.s32.totalorder %s2162_s16, %s2162_s16 }
  0x1d   :  { %p2169_p0 = por %p2168_p13, %p2167_p12 }
  0x1f   :  { %p2170_p1 = pnand %p2169_p0, %p2163_p11 }
  0x21   :  { %2173 = shalt.err (!%p2170_p1)
}
  0x22   :  { %s2206_s1 = smov 256   ;;  %s2207_s17 = smov 16  }
  0x23   :  { %38 = dma.hbm_to_vmem [thread:$0]  %s2504_s2, 2048, %s33_s8, [#allocation7], %s2206_s1, %s2206_s1, %s2207_s17  }
  0x24   :  { %2196 = dma.done.wait [#allocation4], 8192  }
  0x25   :  { %2197 = vsyncadd [#allocation4], 4294959104 }
  0x26   :  { %2198 = dma.done.wait [#allocation7], 2048  }
  0x27   :  { %2199 = vsyncadd [#allocation7], 4294965248  ;;  %v2208_v0 = vmov 0.0   ;;  %v51_v1 = vld [vmem:[#allocation3 + $0x8] sm:$0xff]  ;;  %v53_v3 = vld [vmem:[#allocation3 + $0x18] sm:$0xff]  ;;  %vm198_vm0 = vcmask 261120  }
  0x28   :  { %266 = vmatprep.mubr.f32.mxu0 %v2208_v0  ;;  %337 = vmatprep.mubr.f32.mxu1 %v2208_v0  ;;  %v67_v2 = vld [vmem:[#allocation3 + $0x88] sm:$0xff]  ;;  %v69_v5 = vld [vmem:[#allocation3 + $0x98] sm:$0xff]  ;;  %v50_v6 = vld [vmem:[#allocation3] sm:$0xff]  ;;  %vm900_vm1 = vcmask 523264   ;;  %s2211_s27 = smov [#allocation8]   ;;  %vm1838_vm2 = vcmask 517120  }
  0x29   :  { %v1880_v4 = vpack.c.bf16 %v67_v2, %v51_v1  ;;  %v66_v7 = vld [vmem:[#allocation3 + $0x80] sm:$0xff]  ;;  %v1888_v8 = vpack.c.bf16 %v69_v5, %v53_v3  ;;  %v52_v10 = vld [vmem:[#allocation3 + $0x10] sm:$0xff]  ;;  %v83_v12 = vld [vmem:[#allocation3 + $0x108] sm:$0xff]  ;;  %s1846_s28 = sshll.u32 %s2211_s27, 4  ;;  %s1847_s28 = int_to_ptr.vmem [resolvable:$true] %s1846_s28 }
  0x2a   :  { %v1882_v9 = vpack.c.bf16 %v66_v7, %v50_v6  ;;  %v68_v11 = vld [vmem:[#allocation3 + $0x90] sm:$0xff]  ;;  %v99_v14 = vld [vmem:[#allocation3 + $0x188] sm:$0xff]  ;;  %v85_v15 = vld [vmem:[#allocation3 + $0x118] sm:$0xff]  ;;  %s2174_s29 = scalar_lea.vmem %s1847_s28, 32  ;;  %p2179_p3 = scmp.lt.s32.totalorder %s1847_s28, %s1847_s28 }
  0x2b   :  { %1881 = vmatprep.subr.bf16.mxu0 %v1880_v4  ;;  %v1890_v13 = vpack.c.bf16 %v68_v11, %v52_v10  ;;  %v101_v16 = vld [vmem:[#allocation3 + $0x198] sm:$0xff]  ;;  %1889 = vmatprep.subr.bf16.mxu1 %v1888_v8  ;;  %v1884_v17 = vpack.c.bf16 %v99_v14, %v83_v12  ;;  %v82_v19 = vld [vmem:[#allocation3 + $0x100] sm:$0xff]  ;;  %v84_v21 = vld [vmem:[#allocation3 + $0x110] sm:$0xff]  ;;  %p2175_p2 = scmp.ne.s32.totalorder %s1847_s28, %s2174_s29  ;;  %p2180_p4 = scmp.lt.s32.totalorder %s2174_s29, %s2174_s29 }
  0x2c   :  { %1883 = vmatpush1.bf16.msra.mxu0 %v1882_v9  ;;  %v1892_v18 = vpack.c.bf16 %v101_v16, %v85_v15  ;;  %v98_v20 = vld [vmem:[#allocation3 + $0x180] sm:$0xff]  ;;  %v100_v23 = vld [vmem:[#allocation3 + $0x190] sm:$0xff]  ;;  %v55_v24 = vld [vmem:[#allocation3 + $0x28] sm:$0xff] }
  0x2d   :  { %1891 = vmatpush1.bf16.msra.mxu1 %v1890_v13  ;;  %v1886_v22 = vpack.c.bf16 %v98_v20, %v82_v19  ;;  %1885 = vmatprep.subr.bf16.mxu0 %v1884_v17  ;;  %v1894_v25 = vpack.c.bf16 %v100_v23, %v84_v21  ;;  %v2271_v26 = vld [vmem:[%s2502_s0] sm:$0x3]  ;;  %v71_v27 = vld [vmem:[#allocation3 + $0xa8] sm:$0xff]  ;;  %v57_v28 = vld [vmem:[#allocation3 + $0x38] sm:$0xff]  ;;  %p2181_p5 = por %p2180_p4, %p2179_p3 }
  0x2e   :  { %1893 = vmatprep.subr.bf16.mxu1 %v1892_v18  ;;  %v73_v29 = vld [vmem:[#allocation3 + $0xb8] sm:$0xff]  ;;  %v1896_v30 = vpack.c.bf16 %v71_v27, %v55_v24  ;;  %v54_v32 = vld [vmem:[#allocation3 + $0x20] sm:$0xff]  ;;  %v56_v34 = vld [vmem:[#allocation3 + $0x30] sm:$0xff] }
  0x2f   :  { %v1904_v31 = vpack.c.bf16 %v73_v29, %v57_v28  ;;  %v70_v33 = vld [vmem:[#allocation3 + $0xa0] sm:$0xff]  ;;  %v72_v36 = vld [vmem:[#allocation3 + $0xb0] sm:$0xff]  ;;  %v87_v37 = vld [vmem:[#allocation3 + $0x128] sm:$0xff]  ;;  %p2182_p6 = pnand %p2181_p5, %p2175_p2 }
  0x30   :  { %1887 = vmatpush1.bf16.msra.mxu0 %v1886_v22  ;;  %v1898_v35 = vpack.c.bf16 %v70_v33, %v54_v32  ;;  %v103_v38 = vld [vmem:[#allocation3 + $0x1a8] sm:$0xff]  ;;  %v1906_v39 = vpack.c.bf16 %v72_v36, %v56_v34  ;;  %v89_v41 = vld [vmem:[#allocation3 + $0x138] sm:$0xff]  ;;  %v86_v43 = vld [vmem:[#allocation3 + $0x120] sm:$0xff] }
  0x31   :  { %1895 = vmatpush1.bf16.msra.mxu1 %v1894_v25  ;;  %1897 = vmatprep.subr.bf16.mxu0 %v1896_v30  ;;  %v1900_v40 = vpack.c.bf16 %v103_v38, %v87_v37  ;;  %v105_v42 = vld [vmem:[#allocation3 + $0x1b8] sm:$0xff]  ;;  %v102_v45 = vld [vmem:[#allocation3 + $0x1a0] sm:$0xff]  ;;  %v88_v46 = vld [vmem:[#allocation3 + $0x130] sm:$0xff] }
  0x32   :  { %1905 = vmatprep.subr.bf16.mxu1 %v1904_v31  ;;  %v1908_v44 = vpack.c.bf16 %v105_v42, %v89_v41  ;;  %v104_v47 = vld [vmem:[#allocation3 + $0x1b0] sm:$0xff]  ;;  %v59_v48 = vld [vmem:[#allocation3 + $0x48] sm:$0xff]  ;;  %v61_v50 = vld [vmem:[#allocation3 + $0x58] sm:$0xff]  ;;  %v1902_v51 = vpack.c.bf16 %v102_v45, %v86_v43 }
  0x33   :  { %1856 = vmatmul.mubr.msk.f32.vlgmr.msra.gmra.mrb[0].mxu0 %vm198_vm0, %v2271_v26  ;;  %v75_v49 = vld [vmem:[#allocation3 + $0xc8] sm:$0xff]  ;;  %v77_v52 = vld [vmem:[#allocation3 + $0xd8] sm:$0xff]  ;;  %v1910_v53 = vpack.c.bf16 %v104_v47, %v88_v46  ;;  %v58_v55 = vld [vmem:[#allocation3 + $0x40] sm:$0xff] }
  0x34   :  { %1857 = vmatmul.mubr.msk.f32.vlgmr.msra.gmra.mrb[0].mxu1 %vm198_vm0, %v2271_v26  ;;  %1899 = vmatpush1.bf16.msra.mxu0 %v1898_v35  ;;  %v1912_v54 = vpack.c.bf16 %v75_v49, %v59_v48  ;;  %v74_v56 = vld [vmem:[#allocation3 + $0xc0] sm:$0xff]  ;;  %v60_v57 = vld [vmem:[#allocation3 + $0x50] sm:$0xff]  ;;  %v1920_v58 = vpack.c.bf16 %v77_v52, %v61_v50  ;;  %v91_v60 = vld [vmem:[#allocation3 + $0x148] sm:$0xff] }
  0x35   :  { %1907 = vmatpush1.bf16.msra.mxu1 %v1906_v39  ;;  %1901 = vmatprep.subr.bf16.mxu0 %v1900_v40  ;;  %v76_v59 = vld [vmem:[#allocation3 + $0xd0] sm:$0xff]  ;;  %v107_v61 = vld [vmem:[#allocation3 + $0x1c8] sm:$0xff]  ;;  %v93_v62 = vld [vmem:[#allocation3 + $0x158] sm:$0xff]  ;;  %v1914_v1 = vpack.c.bf16 %v74_v56, %v58_v55 }
  0x36   :  { %1909 = vmatprep.subr.bf16.mxu1 %v1908_v44  ;;  %408 = vmatprep.mubr.f32.mxu0 %v2208_v0  ;;  %v109_v63 = vld [vmem:[#allocation3 + $0x1d8] sm:$0xff]  ;;  %v1922_v2 = vpack.c.bf16 %v76_v59, %v60_v57  ;;  %v1916_v3 = vpack.c.bf16 %v107_v61, %v91_v60  ;;  %v90_v4 = vld [vmem:[#allocation3 + $0x140] sm:$0xff]  ;;  %v92_v6 = vld [vmem:[#allocation3 + $0x150] sm:$0xff]  ;;  %v118_v59 = vlaneseq }
  0x37   :  { %479 = vmatprep.mubr.f32.mxu1 %v2208_v0  ;;  %v106_v5 = vld [vmem:[#allocation3 + $0x1c0] sm:$0xff]  ;;  %v1924_v7 = vpack.c.bf16 %v109_v63, %v93_v62  ;;  %v108_v8 = vld [vmem:[#allocation3 + $0x1d0] sm:$0xff]  ;;  %v63_v9 = vld [vmem:[#allocation3 + $0x68] sm:$0xff]  ;;  %v2209_v62 = vmov 1983009808  }
  0x38   :  { %1903 = vmatpush1.bf16.msra.mxu0 %v1902_v51  ;;  %v79_v10 = vld [vmem:[#allocation3 + $0xe8] sm:$0xff]  ;;  %v65_v11 = vld [vmem:[#allocation3 + $0x78] sm:$0xff]  ;;  %v1918_v13 = vpack.c.bf16 %v106_v5, %v90_v4  ;;  %v1926_v14 = vpack.c.bf16 %v108_v8, %v92_v6  ;;  %v62_v16 = vld [vmem:[#allocation3 + $0x60] sm:$0xff]  ;;  %v2341_v60 = vshrl.u32 %v118_v59, 7  ;;  %v789_v63 = vunpack.c.l.s4 %v2209_v62 }
  0x39   :  { %1911 = vmatpush1.bf16.msra.mxu1 %v1910_v53  ;;  %1913 = vmatprep.subr.bf16.mxu0 %v1912_v54  ;;  %v81_v12 = vld [vmem:[#allocation3 + $0xf8] sm:$0xff]  ;;  %v1928_v15 = vpack.c.bf16 %v79_v10, %v63_v9  ;;  %v78_v17 = vld [vmem:[#allocation3 + $0xe0] sm:$0xff]  ;;  %v64_v18 = vld [vmem:[#allocation3 + $0x70] sm:$0xff] }
  0x3a   :  { %1921 = vmatprep.subr.bf16.mxu1 %v1920_v58  ;;  %v1936_v19 = vpack.c.bf16 %v81_v12, %v65_v11  ;;  %v80_v20 = vld [vmem:[#allocation3 + $0xf0] sm:$0xff]  ;;  %v95_v21 = vld [vmem:[#allocation3 + $0x168] sm:$0xff]  ;;  %v97_v23 = vld [vmem:[#allocation3 + $0x178] sm:$0xff]  ;;  %v1930_v25 = vpack.c.bf16 %v78_v17, %v62_v16  ;;  %v2344_v61 = vsub.s32 0, %v2341_v60  ;;  %v132_v4 = vsub.s32 3, %v2341_v60 }
  0x3b   :  { %1858 = vmatmul.mubr.msk.f32.vlgmr.msra.gmra.mrb[2].mxu0 %vm198_vm0, %v2271_v26  ;;  %v111_v22 = vld [vmem:[#allocation3 + $0x1e8] sm:$0xff]  ;;  %v113_v24 = vld [vmem:[#allocation3 + $0x1f8] sm:$0xff]  ;;  %v1938_v27 = vpack.c.bf16 %v80_v20, %v64_v18  ;;  %v94_v29 = vld [vmem:[#allocation3 + $0x160] sm:$0xff]  ;;  %v790_v6 = vunpack.c.0.s8 %v789_v63  ;;  %v140_v20 = vsub.s32 5, %v2341_v60 }
  0x3c   :  { %1859 = vmatmul.mubr.msk.f32.vlgmr.msra.gmra.mrb[2].mxu1 %vm198_vm0, %v2271_v26  ;;  %1915 = vmatpush1.bf16.msra.mxu0 %v1914_v1  ;;  %v1932_v28 = vpack.c.bf16 %v111_v22, %v95_v21  ;;  %v110_v30 = vld [vmem:[#allocation3 + $0x1e0] sm:$0xff]  ;;  %v96_v31 = vld [vmem:[#allocation3 + $0x170] sm:$0xff]  ;;  %v1940_v32 = vpack.c.bf16 %v113_v24, %v97_v23  ;;  %v885_v34 = vld [vmem:[#allocation6 + $0x8] sm:$0xff]  ;;  %v148_v22 = vsub.s32 7, %v2341_v60 }
  0x3d   :  { %1923 = vmatpush1.bf16.msra.mxu1 %v1922_v2  ;;  %1917 = vmatprep.subr.bf16.mxu0 %v1916_v3  ;;  %v112_v33 = vld [vmem:[#allocation3 + $0x1f0] sm:$0xff]  ;;  %v887_v35 = vld [vmem:[#allocation6 + $0x18] sm:$0xff]  ;;  %v1934_v36 = vpack.c.bf16 %v110_v30, %v94_v29  ;;  %v884_v39 = vld [vmem:[#allocation6] sm:$0xff]  ;;  %v128_v2 = vsub.s32 2, %v2341_v60  ;;  %v2351_v3 = vsub.s32 1, %v2341_v60  ;;  %v2357_v12 = vsub.s32 %v790_v6, %v2341_v60 }
  0x3e   :  { %1925 = vmatprep.subr.bf16.mxu1 %v1924_v7  ;;  %550 = vmatprep.mubr.f32.mxu0 %v2208_v0  ;;  %v1942_v37 = vpack.c.bf16 %v112_v33, %v96_v31  ;;  %v2289_v38 = vpack.c.bf16 %v887_v35, %v885_v34  ;;  %v886_v40 = vld [vmem:[#allocation6 + $0x10] sm:$0xff]  ;;  %v889_v41 = vld [vmem:[#allocation6 + $0x28] sm:$0xff]  ;;  %v891_v42 = vld [vmem:[#allocation6 + $0x38] sm:$0xff] }
  0x3f   :  { %621 = vmatprep.mubr.f32.mxu1 %v2208_v0  ;;  %v2293_v43 = vpack.c.bf16 %v886_v40, %v884_v39  ;;  %v2296_v44 = vpack.c.bf16 %v891_v42, %v889_v41  ;;  %v888_v45 = vld [vmem:[#allocation6 + $0x20] sm:$0xff]  ;;  %v890_v46 = vld [vmem:[#allocation6 + $0x30] sm:$0xff]  ;;  %v893_v47 = vld [vmem:[#allocation6 + $0x48] sm:$0xff] }
  0x40   :  { %1919 = vmatpush1.bf16.msra.mxu0 %v1918_v13  ;;  %v895_v48 = vld [vmem:[#allocation6 + $0x58] sm:$0xff]  ;;  %v2304_v49 = vpack.c.bf16 %v890_v46, %v888_v45  ;;  %v892_v51 = vld [vmem:[#allocation6 + $0x40] sm:$0xff]  ;;  %v894_v52 = vld [vmem:[#allocation6 + $0x50] sm:$0xff] }
  0x41   :  { %1927 = vmatpush1.bf16.msra.mxu1 %v1926_v14  ;;  %1929 = vmatprep.subr.bf16.mxu0 %v1928_v15  ;;  %v2307_v50 = vpack.c.bf16 %v895_v48, %v893_v47  ;;  %v897_v53 = vld [vmem:[#allocation6 + $0x68] sm:$0xff]  ;;  %v899_v54 = vld [vmem:[#allocation6 + $0x78] sm:$0xff]  ;;  %v896_v56 = vld [vmem:[#allocation6 + $0x60] sm:$0xff]  ;;  %v136_v15 = vsub.s32 4, %v2341_v60 }
  0x42   :  { %1937 = vmatprep.subr.bf16.mxu1 %v1936_v19  ;;  %v2317_v55 = vpack.c.bf16 %v899_v54, %v897_v53  ;;  %v898_v57 = vld [vmem:[#allocation6 + $0x70] sm:$0xff]  ;;  %v144_v19 = vsub.s32 6, %v2341_v60  ;;  %v115_v41 = vld [vmem:[%s2505_s3 + $0x8] sm:$0xff] }
  0x43   :  { %1860 = vmatmul.mubr.msk.f32.vlgmr.msra.gmra.mrb[4].mxu0 %vm198_vm0, %v2271_v26  ;;  %v2322_v58 = vpack.c.bf16 %v898_v57, %v896_v56  ;;  %v114_v1 = vld [vmem:[%s2505_s3] sm:$0xff]  ;;  %v153_v47 = vrot.slane %v115_v41, %v2344_v61  ;;  %v165_v54 = vrot.slane %v115_v41, %v132_v4 }
  0x44   :  { %1861 = vmatmul.mubr.msk.f32.vlgmr.msra.gmra.mrb[4].mxu1 %vm198_vm0, %v2271_v26  ;;  %1931 = vmatpush1.bf16.msra.mxu0 %v1930_v25  ;;  %v121_v5 = vrot.slane %v114_v1, %v2344_v61  ;;  %v129_v7 = vrot.slane %v114_v1, %v128_v2  ;;  %v125_v8 = vrot.slane %v114_v1, %v2351_v3 }
  0x45   :  { %1939 = vmatpush1.bf16.msra.mxu1 %v1938_v27  ;;  %1933 = vmatprep.subr.bf16.mxu0 %v1932_v28  ;;  %v133_v9 = vrot.slane %v114_v1, %v132_v4  ;;  %v137_v25 = vrot.slane %v114_v1, %v136_v15  ;;  %v145_v28 = vrot.slane %v114_v1, %v144_v19 }
  0x46   :  { %1941 = vmatprep.subr.bf16.mxu1 %v1940_v32  ;;  %692 = vmatprep.mubr.f32.mxu0 %v2208_v0  ;;  %v141_v29 = vrot.slane %v114_v1, %v140_v20  ;;  %v149_v31 = vrot.slane %v114_v1, %v148_v22  ;;  %v181_v4 = vrot.slane %v115_v41, %v148_v22 }
  0x47   :  { %763 = vmatprep.mubr.f32.mxu1 %v2208_v0 }
  0x48   :  { %1935 = vmatpush1.bf16.msra.mxu0 %v1934_v36 }
  0x49   :  { %1943 = vmatpush1.bf16.msra.mxu1 %v1942_v37  ;;  %1945 = vmatprep.subr.bf16.mxu0 %v2289_v38 }
  0x4a   :  { %1961 = vmatprep.subr.bf16.mxu1 %v2289_v38 }
  0x4b   :  { %1862 = vmatmul.mubr.msk.f32.vlgmr.msra.gmra.mrb[6].mxu0 %vm198_vm0, %v2271_v26 }
  0x4c   :  { %1863 = vmatmul.mubr.msk.f32.vlgmr.msra.gmra.mrb[6].mxu1 %vm198_vm0, %v2271_v26  ;;  %1947 = vmatpush1.bf16.msra.mxu0 %v2293_v43  ;;  %v2314_v26 = vpack.c.bf16 %v894_v52, %v892_v51  ;;  %v161_v51 = vrot.slane %v115_v41, %v128_v2  ;;  %v157_v52 = vrot.slane %v115_v41, %v2351_v3 }
  0x4d   :  { %1949 = vmatprep.subr.bf16.mxu0 %v2296_v44  ;;  %968 = vmatprep.mubr.f32.mxu0 %v2208_v0 }
  0x4e   :  { %1963 = vmatpush1.bf16.msra.mxu1 %v2293_v43  ;;  %1101 = vmatprep.mubr.f32.mxu1 %v2208_v0 }
  0x4f   :  { %1965 = vmatprep.subr.bf16.mxu1 %v2296_v44 }
  0x50   :  { %1951 = vmatpush1.bf16.msra.mxu0 %v2304_v49 }
  0x51   :  { %1953 = vmatprep.subr.bf16.mxu0 %v2307_v50 }
  0x52   :  { %1967 = vmatpush1.bf16.msra.mxu1 %v2304_v49 }
  0x53   :  { %1969 = vmatprep.subr.bf16.mxu1 %v2307_v50 }
  0x54   :  { %1955 = vmatpush1.bf16.msra.mxu0 %v2314_v26 }
  0x55   :  { %1957 = vmatprep.subr.bf16.mxu0 %v2317_v55 }
  0x56   :  { %1971 = vmatpush1.bf16.msra.mxu1 %v2314_v26 }
  0x57   :  { %1973 = vmatprep.subr.bf16.mxu1 %v2317_v55 }
  0x58   :  { %1959 = vmatpush1.bf16.msra.mxu0 %v2322_v58 }
  0x59   :  { %1977 = vmatprep.subr.bf16.mxu0 %v2289_v38 }
  0x5a   :  { %1975 = vmatpush1.bf16.msra.mxu1 %v2322_v58 }
  0x5b   :  { %969 = vmatmul.mubr.f32.vlgmr.msra.gmra.mrb[8].mxu0 %v2208_v0  ;;  %1993 = vmatprep.subr.bf16.mxu1 %v2289_v38 }
  0x5c   :  { %1979 = vmatpush1.bf16.msra.mxu0 %v2293_v43  ;;  %1216 = vmatprep.mubr.f32.mxu0 %v2208_v0 }
  0x5d   :  { %1981 = vmatprep.subr.bf16.mxu0 %v2296_v44 }
  0x60   :  { %1983 = vmatpush1.bf16.msra.mxu0 %v2304_v49 }
  0x61   :  { %1985 = vmatprep.subr.bf16.mxu0 %v2307_v50 }
  0x64   :  { %1987 = vmatpush1.bf16.msra.mxu0 %v2314_v26 }
  0x65   :  { %1989 = vmatprep.subr.bf16.mxu0 %v2317_v55 }
  0x68   :  { %1991 = vmatpush1.bf16.msra.mxu0 %v2322_v58 }
  0x69   :  { %2009 = vmatprep.subr.bf16.mxu0 %v2289_v38 }
 0x106   :  { %v268_v10 = vpop.f32.mrb[0].mxu0 }
 0x107   :  { %v269_v11 = vadd.f32 %v268_v10, %v121_v5  ;;  %v339_v13 = vpop.f32.mrb[0].mxu1  ;;  %v270_v14 = vpop.f32.mrb[1].mxu0  ;;  %v177_v10 = vrot.slane %v115_v41, %v144_v19 }
 0x108   :  { %v340_v16 = vadd.f32 %v339_v13, %v129_v7  ;;  %v271_v17 = vadd.f32 %v270_v14, %v125_v8  ;;  %v341_v18 = vpop.f32.mrb[1].mxu1 }
 0x109   :  { %v342_v21 = vadd.f32 %v341_v18, %v133_v9  ;;  %v169_v9 = vrot.slane %v115_v41, %v136_v15 }
 0x10a   :  { %v786_v23 = vcombine.low %v269_v11, %v271_v17  ;;  %v173_v11 = vrot.slane %v115_v41, %v140_v20 }
 0x10b   :  { %v787_v24 = vcombine.low %v340_v16, %v342_v21 }
 0x10c   :  { %v794_v27 = vrot.slane %v786_v23, %v2357_v12 }
 0x10d   :  { %v801_v30 = vrot.slane %v787_v24, %v2357_v12 }
 0x10e   :  { %v410_v32 = vpop.f32.mrb[2].mxu0 }
 0x10f   :  { %v802_v33 = vcombine.low %v794_v27, %v801_v30  ;;  %v411_v34 = vadd.f32 %v410_v32, %v137_v25  ;;  %v481_v35 = vpop.f32.mrb[2].mxu1  ;;  %v412_v36 = vpop.f32.mrb[3].mxu0 }
 0x110   :  { %v482_v37 = vadd.f32 %v481_v35, %v145_v28  ;;  %v413_v39 = vadd.f32 %v412_v36, %v141_v29  ;;  %v483_v40 = vpop.f32.mrb[3].mxu1  ;;  %v862_v36 = vld [vmem:[%s2506_s4] ss:$2 sm:$0x3] }
 0x111   :  { %858 = vst [vmem:[#allocation2] sm:$0xff] %v802_v33  ;;  %v484_v42 = vadd.f32 %v483_v40, %v149_v31  ;;  %v867_v41 = vrot.slane %v862_v36, %v2344_v61 }
 0x112   :  { %v803_v45 = vcombine.low %v411_v34, %v413_v39  ;;  %v1864_v39 = vld [vmem:[%s2506_s4 + $0x1] ss:$2 sm:$0x3]  ;;  %s2210_s4 = smov 64  }
 0x113   :  { %v804_v46 = vcombine.low %v482_v37, %v484_v42  ;;  %v871_v42 = vrot.slane %v862_v36, %v2351_v3 }
 0x114   :  { %v811_v48 = vrot.slane %v803_v45, %v2357_v12  ;;  %v878_v45 = vrot.slane %v1864_v39, %v2344_v61 }
 0x115   :  { %v818_v53 = vrot.slane %v804_v46, %v2357_v12  ;;  %v882_v46 = vrot.slane %v1864_v39, %v2351_v3 }
 0x116   :  { %v552_v56 = vpop.f32.mrb[4].mxu0 }
 0x117   :  { %v819_v57 = vcombine.low %v811_v48, %v818_v53  ;;  %v553_v59 = vadd.f32 %v552_v56, %v153_v47  ;;  %v623_v60 = vpop.f32.mrb[4].mxu1  ;;  %v554_v62 = vpop.f32.mrb[5].mxu0  ;;  %v993_v47 = vcombine.low %v867_v41, %v871_v42  ;;  %v1003_v48 = vcombine.low %v878_v45, %v882_v46 }
 0x118   :  { %v624_v63 = vadd.f32 %v623_v60, %v161_v51  ;;  %v555_v1 = vadd.f32 %v554_v62, %v157_v52  ;;  %v625_v5 = vpop.f32.mrb[5].mxu1  ;;  %v883_v33 = vld [vmem:[#allocation2] sm:$0xf] }
 0x119   :  { %859 = vst [vmem:[#allocation2 + $0x8] sm:$0xff] %v819_v57  ;;  %v626_v6 = vadd.f32 %v625_v5, %v165_v54  ;;  %v2388_v51 = vrot.slane %v993_v47, %v2357_v12  ;;  %v2391_v52 = vrot.slane %v1003_v48, %v2357_v12 }
 0x11a   :  { %v820_v7 = vcombine.low %v553_v59, %v555_v1 }
 0x11b   :  { %v821_v8 = vcombine.low %v624_v63, %v626_v6 }
 0x11c   :  { %v828_v2 = vrot.slane %v820_v7, %v2357_v12 }
 0x11d   :  { %v835_v13 = vrot.slane %v821_v8, %v2357_v12 }
 0x11e   :  { %v694_v14 = vpop.f32.mrb[6].mxu0 }
 0x11f   :  { %v836_v16 = vcombine.low %v828_v2, %v835_v13  ;;  %v695_v17 = vadd.f32 %v694_v14, %v169_v9  ;;  %v765_v18 = vpop.f32.mrb[6].mxu1  ;;  %v696_v21 = vpop.f32.mrb[7].mxu0 }
 0x120   :  { %v766_v23 = vadd.f32 %v765_v18, %v177_v10  ;;  %v697_v24 = vadd.f32 %v696_v21, %v173_v11  ;;  %v767_v25 = vpop.f32.mrb[7].mxu1  ;;  %v1033_v10 = vld [vmem:[#allocation2 + $0x4] sm:$0xf] }
 0x121   :  { %860 = vst [vmem:[#allocation2 + $0x10] sm:$0xff] %v836_v16  ;;  %v768_v27 = vadd.f32 %v767_v25, %v181_v4 }
 0x122   :  { %v837_v28 = vcombine.low %v695_v17, %v697_v24 }
 0x123   :  { %v838_v29 = vcombine.low %v766_v23, %v768_v27 }
 0x124   :  { %v845_v15 = vrot.slane %v837_v28, %v2357_v12 }
 0x125   :  { %v852_v19 = vrot.slane %v838_v29, %v2357_v12 }
 0x127   :  { %v853_v20 = vcombine.low %v845_v15, %v852_v19 }
 0x129   :  { %861 = vst [vmem:[#allocation2 + $0x18] sm:$0xff] %v853_v20 }
 0x12e   :  { %v970_v30 = vpop.f32.mrb[8].mxu0 }
 0x12f   :  { %v972_v22 = vpop.f32.mrb[9].mxu0 }
 0x130   :  { %v977_v31 = vcombine.low %v970_v30, %v972_v22 }
 0x132   :  { %v984_v32 = vrot.slane %v977_v31, %v2357_v12 }
 0x134   :  { %v986_v34 = vadd.f32 %v984_v32, %v883_v33  ;;  %v1148_v33 = vld [vmem:[#allocation2 + $0x8] sm:$0xf] }
 0x136   :  { %v1865_v35 = vmul.f32 -1.442695, %v986_v34 }
 0x138   :  { %2082 = vpow2.f32 %v1865_v35 }
 0x142   :  { %v2083_v37 = vpop.eup %2082 }
 0x143   :  { %v990_v40 = vadd.f32 1.0, %v2083_v37 }
 0x145   :  { %2084 = vrcp.f32 %v990_v40 }
 0x14f   :  { %v2085_v53 = vpop.eup %2084 }
 0x150   :  { %v1002_v54 = vmul.f32 %v2085_v53, %v2388_v51 }
 0x152   :  { %v1012_v56 = vadd.f32 %v2391_v52, %v1002_v54 }
 0x154   :  { %v1015_v57 = vrot.slane %v1012_v56, 2  ;;  %v1013_v61 = vmul.f32 0.0, %v1012_v56 }
 0x156   :  { %v1017_v59 = vmul.f32 %v1015_v57, %v1012_v56 }
 0x158   :  { %1019 = vrot.lane.b32.xlu0 %v1017_v59, %s2210_s4 }
 0x15c   :  { %1024 = vrot.lane.b32.xlu0 %v1012_v56, %s2210_s4 }
 0x1ca   :  { %v1020_v3 = vpop.permute.xlu0 %1019 }
 0x1cb   :  { %v1022_v60 = vadd.f32 %v1020_v3, %v1013_v61 }
 0x1cd   :  { %2086 = vtanh.f32 %v1022_v60 }
 0x1ce   :  { %v1025_v63 = vpop.permute.xlu0 %1024 }
 0x1cf   :  { %v1026_v1 = vrot.slane %v1025_v63, 2  ;;  %v1263_v63 = vld [vmem:[#allocation2 + $0xc] sm:$0xf] }
 0x1d7   :  { %v2087_v62 = vpop.eup %2086 }
 0x1d8   :  { %1029 = vrot.lane.b32.xlu1 %v2087_v62, %s2210_s4 }
 0x24a   :  { %v1030_v5 = vpop.permute.xlu1 %1029 }
 0x24b   :  { %v1032_v6 = vmul.f32 %v1030_v5, %v1026_v1 }
 0x24d   :  { %1866 = vmatmul.mubr.msk.f32.vlgmr.msra.gmra.mrb[8].mxu1 %vm900_vm1, %v1032_v6 }
 0x24e   :  { %1995 = vmatpush1.bf16.msra.mxu1 %v2293_v43  ;;  %1331 = vmatprep.mubr.f32.mxu1 %v2208_v0 }
 0x24f   :  { %1997 = vmatprep.subr.bf16.mxu1 %v2296_v44 }
 0x252   :  { %1999 = vmatpush1.bf16.msra.mxu1 %v2304_v49 }
 0x253   :  { %2001 = vmatprep.subr.bf16.mxu1 %v2307_v50 }
 0x256   :  { %2003 = vmatpush1.bf16.msra.mxu1 %v2314_v26 }
 0x257   :  { %2005 = vmatprep.subr.bf16.mxu1 %v2317_v55 }
 0x25a   :  { %2007 = vmatpush1.bf16.msra.mxu1 %v2322_v58 }
 0x25b   :  { %2025 = vmatprep.subr.bf16.mxu1 %v2289_v38 }
 0x320   :  { %v1103_v7 = vpop.f32.mrb[8].mxu1 }
 0x321   :  { %v1105_v8 = vpop.f32.mrb[9].mxu1 }
 0x322   :  { %v1110_v9 = vcombine.low %v1103_v7, %v1105_v8 }
 0x324   :  { %v1117_v2 = vrot.slane %v1110_v9, %v2357_v12 }
 0x326   :  { %v1119_v11 = vadd.f32 %v1117_v2, %v1033_v10 }
 0x328   :  { %v1867_v13 = vmul.f32 -1.442695, %v1119_v11 }
 0x32a   :  { %2088 = vpow2.f32 %v1867_v13 }
 0x334   :  { %v2089_v4 = vpop.eup %2088 }
 0x335   :  { %v1123_v14 = vadd.f32 1.0, %v2089_v4 }
 0x337   :  { %2090 = vrcp.f32 %v1123_v14 }
 0x341   :  { %v2091_v16 = vpop.eup %2090 }
 0x342   :  { %v1126_v17 = vmul.f32 %v2091_v16, %v2388_v51 }
 0x344   :  { %v1127_v18 = vadd.f32 %v1126_v17, %v2391_v52 }
 0x346   :  { %1139 = vrot.lane.b32.xlu0 %v1127_v18, %s2210_s4  ;;  %v1130_v21 = vrot.slane %v1127_v18, 2  ;;  %v1128_v24 = vmul.f32 %v1127_v18, %v1022_v60 }
 0x348   :  { %v1132_v23 = vmul.f32 %v1130_v21, %v1127_v18 }
 0x34a   :  { %1134 = vrot.lane.b32.xlu1 %v1132_v23, %s2210_s4 }
 0x3b8   :  { %v1140_v29 = vpop.permute.xlu0 %1139 }
 0x3b9   :  { %v1141_v15 = vrot.slane %v1140_v29, 2 }
 0x3bc   :  { %v1135_v25 = vpop.permute.xlu1 %1134 }
 0x3bd   :  { %v1137_v27 = vadd.f32 %v1135_v25, %v1128_v24 }
 0x3bf   :  { %2092 = vtanh.f32 %v1137_v27 }
 0x3c9   :  { %v2093_v28 = vpop.eup %2092 }
 0x3ca   :  { %1144 = vrot.lane.b32.xlu1 %v2093_v28, %s2210_s4  ;;  %v1378_v28 = vld [vmem:[#allocation2 + $0x10] sm:$0xf] }
 0x43c   :  { %v1145_v19 = vpop.permute.xlu1 %1144 }
 0x43d   :  { %v1147_v20 = vmul.f32 %v1145_v19, %v1141_v15 }
 0x43f   :  { %1868 = vmatmul.mubr.msk.f32.vlgmr.msra.gmra.mrb[10].mxu0 %vm900_vm1, %v1147_v20 }
 0x440   :  { %2011 = vmatpush1.bf16.msra.mxu0 %v2293_v43  ;;  %1446 = vmatprep.mubr.f32.mxu0 %v2208_v0 }
 0x441   :  { %2013 = vmatprep.subr.bf16.mxu0 %v2296_v44 }
 0x444   :  { %2015 = vmatpush1.bf16.msra.mxu0 %v2304_v49 }
 0x445   :  { %2017 = vmatprep.subr.bf16.mxu0 %v2307_v50 }
 0x448   :  { %2019 = vmatpush1.bf16.msra.mxu0 %v2314_v26 }
 0x449   :  { %2021 = vmatprep.subr.bf16.mxu0 %v2317_v55 }
 0x44c   :  { %2023 = vmatpush1.bf16.msra.mxu0 %v2322_v58 }
 0x44d   :  { %2041 = vmatprep.subr.bf16.mxu0 %v2289_v38 }
 0x512   :  { %v1218_v30 = vpop.f32.mrb[10].mxu0 }
 0x513   :  { %v1220_v22 = vpop.f32.mrb[11].mxu0 }
 0x514   :  { %v1225_v31 = vcombine.low %v1218_v30, %v1220_v22 }
 0x516   :  { %v1232_v32 = vrot.slane %v1225_v31, %v2357_v12 }
 0x518   :  { %v1234_v34 = vadd.f32 %v1232_v32, %v1148_v33 }
 0x51a   :  { %v1869_v35 = vmul.f32 -1.442695, %v1234_v34 }
 0x51c   :  { %2094 = vpow2.f32 %v1869_v35 }
 0x526   :  { %v2095_v36 = vpop.eup %2094 }
 0x527   :  { %v1238_v37 = vadd.f32 1.0, %v2095_v36 }
 0x529   :  { %2096 = vrcp.f32 %v1238_v37 }
 0x533   :  { %v2097_v39 = vpop.eup %2096 }
 0x534   :  { %v1241_v40 = vmul.f32 %v2097_v39, %v2388_v51 }
 0x536   :  { %v1242_v41 = vadd.f32 %v1241_v40, %v2391_v52 }
 0x538   :  { %1254 = vrot.lane.b32.xlu1 %v1242_v41, %s2210_s4  ;;  %v1245_v42 = vrot.slane %v1242_v41, 2  ;;  %v1243_v46 = vmul.f32 %v1242_v41, %v1137_v27 }
 0x53a   :  { %v1247_v45 = vmul.f32 %v1245_v42, %v1242_v41 }
 0x53c   :  { %1249 = vrot.lane.b32.xlu0 %v1247_v45, %s2210_s4 }
 0x5aa   :  { %v1255_v54 = vpop.permute.xlu1 %1254 }
 0x5ab   :  { %v1256_v56 = vrot.slane %v1255_v54, 2 }
 0x5ae   :  { %v1250_v47 = vpop.permute.xlu0 %1249 }
 0x5af   :  { %v1252_v48 = vadd.f32 %v1250_v47, %v1243_v46 }
 0x5b1   :  { %2098 = vtanh.f32 %v1252_v48 }
 0x5bb   :  { %v2099_v53 = vpop.eup %2098 }
 0x5bc   :  { %1259 = vrot.lane.b32.xlu0 %v2099_v53, %s2210_s4 }
 0x62e   :  { %v1260_v57 = vpop.permute.xlu0 %1259 }
 0x62f   :  { %v1262_v59 = vmul.f32 %v1260_v57, %v1256_v56 }
 0x631   :  { %1870 = vmatmul.mubr.msk.f32.vlgmr.msra.gmra.mrb[10].mxu1 %vm900_vm1, %v1262_v59 }
 0x632   :  { %2027 = vmatpush1.bf16.msra.mxu1 %v2293_v43  ;;  %1561 = vmatprep.mubr.f32.mxu1 %v2208_v0 }
 0x633   :  { %2029 = vmatprep.subr.bf16.mxu1 %v2296_v44 }
 0x636   :  { %2031 = vmatpush1.bf16.msra.mxu1 %v2304_v49 }
 0x637   :  { %2033 = vmatprep.subr.bf16.mxu1 %v2307_v50 }
 0x63a   :  { %2035 = vmatpush1.bf16.msra.mxu1 %v2314_v26 }
 0x63b   :  { %2037 = vmatprep.subr.bf16.mxu1 %v2317_v55 }
 0x63e   :  { %2039 = vmatpush1.bf16.msra.mxu1 %v2322_v58 }
 0x63f   :  { %2057 = vmatprep.subr.bf16.mxu1 %v2289_v38 }
 0x704   :  { %v1333_v61 = vpop.f32.mrb[10].mxu1 }
 0x705   :  { %v1335_v3 = vpop.f32.mrb[11].mxu1 }
 0x706   :  { %v1340_v60 = vcombine.low %v1333_v61, %v1335_v3 }
 0x708   :  { %v1347_v62 = vrot.slane %v1340_v60, %v2357_v12 }
 0x70a   :  { %v1349_v1 = vadd.f32 %v1347_v62, %v1263_v63 }
 0x70c   :  { %v1871_v5 = vmul.f32 -1.442695, %v1349_v1 }
 0x70e   :  { %2100 = vpow2.f32 %v1871_v5 }
 0x718   :  { %v2101_v6 = vpop.eup %2100 }
 0x719   :  { %v1353_v7 = vadd.f32 1.0, %v2101_v6 }
 0x71b   :  { %2102 = vrcp.f32 %v1353_v7 }
 0x725   :  { %v2103_v8 = vpop.eup %2102 }
 0x726   :  { %v1356_v9 = vmul.f32 %v2103_v8, %v2388_v51  ;;  %v1608_v8 = vld [vmem:[#allocation2 + $0x18] sm:$0xf] }
 0x728   :  { %v1357_v2 = vadd.f32 %v1356_v9, %v2391_v52 }
 0x72a   :  { %1369 = vrot.lane.b32.xlu0 %v1357_v2, %s2210_s4  ;;  %v1360_v38 = vrot.slane %v1357_v2, 2  ;;  %v1358_v11 = vmul.f32 %v1357_v2, %v1252_v48 }
 0x72c   :  { %v1362_v10 = vmul.f32 %v1360_v38, %v1357_v2 }
 0x72e   :  { %1364 = vrot.lane.b32.xlu1 %v1362_v10, %s2210_s4 }
 0x79c   :  { %v1370_v16 = vpop.permute.xlu0 %1369 }
 0x79d   :  { %v1371_v17 = vrot.slane %v1370_v16, 2 }
 0x7a0   :  { %v1365_v13 = vpop.permute.xlu1 %1364 }
 0x7a1   :  { %v1367_v4 = vadd.f32 %v1365_v13, %v1358_v11 }
 0x7a3   :  { %2104 = vtanh.f32 %v1367_v4 }
 0x7ad   :  { %v2105_v14 = vpop.eup %2104 }
 0x7ae   :  { %1374 = vrot.lane.b32.xlu1 %v2105_v14, %s2210_s4 }
 0x820   :  { %v1375_v18 = vpop.permute.xlu1 %1374 }
 0x821   :  { %v1377_v21 = vmul.f32 %v1375_v18, %v1371_v17 }
 0x823   :  { %1872 = vmatmul.mubr.msk.f32.vlgmr.msra.gmra.mrb[12].mxu0 %vm900_vm1, %v1377_v21 }
 0x824   :  { %2043 = vmatpush1.bf16.msra.mxu0 %v2293_v43  ;;  %1676 = vmatprep.mubr.f32.mxu0 %v2208_v0 }
 0x825   :  { %2045 = vmatprep.subr.bf16.mxu0 %v2296_v44 }
 0x828   :  { %2047 = vmatpush1.bf16.msra.mxu0 %v2304_v49 }
 0x829   :  { %2049 = vmatprep.subr.bf16.mxu0 %v2307_v50 }
 0x82c   :  { %2051 = vmatpush1.bf16.msra.mxu0 %v2314_v26 }
 0x82d   :  { %2053 = vmatprep.subr.bf16.mxu0 %v2317_v55 }
 0x830   :  { %2055 = vmatpush1.bf16.msra.mxu0 %v2322_v58 }
 0x8f6   :  { %v1448_v23 = vpop.f32.mrb[12].mxu0 }
 0x8f7   :  { %v1450_v24 = vpop.f32.mrb[13].mxu0 }
 0x8f8   :  { %v1455_v25 = vcombine.low %v1448_v23, %v1450_v24 }
 0x8fa   :  { %v1462_v27 = vrot.slane %v1455_v25, %v2357_v12 }
 0x8fc   :  { %v1464_v29 = vadd.f32 %v1462_v27, %v1378_v28 }
 0x8fe   :  { %v1873_v15 = vmul.f32 -1.442695, %v1464_v29 }
 0x900   :  { %2106 = vpow2.f32 %v1873_v15 }
 0x90a   :  { %v2107_v19 = vpop.eup %2106 }
 0x90b   :  { %v1468_v20 = vadd.f32 1.0, %v2107_v19 }
 0x90d   :  { %2108 = vrcp.f32 %v1468_v20 }
 0x917   :  { %v2109_v30 = vpop.eup %2108 }
 0x918   :  { %v1471_v22 = vmul.f32 %v2109_v30, %v2388_v51  ;;  %v1723_v30 = vld [vmem:[#allocation2 + $0x1c] sm:$0xf] }
 0x91a   :  { %v1472_v31 = vadd.f32 %v1471_v22, %v2391_v52 }
 0x91c   :  { %1484 = vrot.lane.b32.xlu1 %v1472_v31, %s2210_s4  ;;  %v1475_v32 = vrot.slane %v1472_v31, 2  ;;  %v1473_v34 = vmul.f32 %v1472_v31, %v1367_v4 }
 0x91e   :  { %v1477_v33 = vmul.f32 %v1475_v32, %v1472_v31 }
 0x920   :  { %1479 = vrot.lane.b32.xlu0 %v1477_v33, %s2210_s4 }
 0x98e   :  { %v1485_v39 = vpop.permute.xlu1 %1484 }
 0x98f   :  { %v1486_v40 = vrot.slane %v1485_v39, 2 }
 0x992   :  { %v1480_v35 = vpop.permute.xlu0 %1479 }
 0x993   :  { %v1482_v36 = vadd.f32 %v1480_v35, %v1473_v34 }
 0x995   :  { %2110 = vtanh.f32 %v1482_v36 }
 0x99f   :  { %v2111_v37 = vpop.eup %2110 }
 0x9a0   :  { %1489 = vrot.lane.b32.xlu0 %v2111_v37, %s2210_s4 }
 0xa12   :  { %v1490_v41 = vpop.permute.xlu0 %1489 }
 0xa13   :  { %v1492_v42 = vmul.f32 %v1490_v41, %v1486_v40 }
 0xa15   :  { %1874 = vmatmul.mubr.msk.f32.vlgmr.msra.gmra.mrb[12].mxu1 %vm900_vm1, %v1492_v42 }
 0xa16   :  { %2059 = vmatpush1.bf16.msra.mxu1 %v2293_v43  ;;  %1791 = vmatprep.mubr.f32.mxu1 %v2208_v0  ;;  %v1493_v43 = vld [vmem:[#allocation2 + $0x14] sm:$0xf] }
 0xa17   :  { %2061 = vmatprep.subr.bf16.mxu1 %v2296_v44 }
 0xa1a   :  { %2063 = vmatpush1.bf16.msra.mxu1 %v2304_v49 }
 0xa1b   :  { %2065 = vmatprep.subr.bf16.mxu1 %v2307_v50 }
 0xa1e   :  { %2067 = vmatpush1.bf16.msra.mxu1 %v2314_v26 }
 0xa1f   :  { %2069 = vmatprep.subr.bf16.mxu1 %v2317_v55 }
 0xa22   :  { %2071 = vmatpush1.bf16.msra.mxu1 %v2322_v58 }
 0xae8   :  { %v1563_v45 = vpop.f32.mrb[12].mxu1 }
 0xae9   :  { %v1565_v46 = vpop.f32.mrb[13].mxu1 }
 0xaea   :  { %v1570_v47 = vcombine.low %v1563_v45, %v1565_v46 }
 0xaec   :  { %v1577_v48 = vrot.slane %v1570_v47, %v2357_v12 }
 0xaee   :  { %v1579_v53 = vadd.f32 %v1577_v48, %v1493_v43 }
 0xaf0   :  { %v1875_v0 = vmul.f32 -1.442695, %v1579_v53 }
 0xaf2   :  { %2112 = vpow2.f32 %v1875_v0 }
 0xafc   :  { %v2113_v44 = vpop.eup %2112 }
 0xafd   :  { %v1583_v54 = vadd.f32 1.0, %v2113_v44 }
 0xaff   :  { %2114 = vrcp.f32 %v1583_v54 }
 0xb09   :  { %v2115_v49 = vpop.eup %2114 }
 0xb0a   :  { %v1586_v50 = vmul.f32 %v2115_v49, %v2388_v51 }
 0xb0c   :  { %v1587_v26 = vadd.f32 %v1586_v50, %v2391_v52 }
 0xb0e   :  { %1599 = vrot.lane.b32.xlu0 %v1587_v26, %s2210_s4  ;;  %v1590_v55 = vrot.slane %v1587_v26, 2  ;;  %v1588_v56 = vmul.f32 %v1587_v26, %v1482_v36 }
 0xb10   :  { %v1592_v58 = vmul.f32 %v1590_v55, %v1587_v26 }
 0xb12   :  { %1594 = vrot.lane.b32.xlu1 %v1592_v58, %s2210_s4 }
 0xb80   :  { %v1600_v3 = vpop.permute.xlu0 %1599 }
 0xb81   :  { %v1601_v60 = vrot.slane %v1600_v3, 2 }
 0xb84   :  { %v1595_v57 = vpop.permute.xlu1 %1594 }
 0xb85   :  { %v1597_v59 = vadd.f32 %v1595_v57, %v1588_v56 }
 0xb87   :  { %2116 = vtanh.f32 %v1597_v59 }
 0xb91   :  { %v2117_v61 = vpop.eup %2116 }
 0xb92   :  { %1604 = vrot.lane.b32.xlu1 %v2117_v61, %s2210_s4 }
 0xc04   :  { %v1605_v62 = vpop.permute.xlu1 %1604 }
 0xc05   :  { %v1607_v63 = vmul.f32 %v1605_v62, %v1601_v60 }
 0xc07   :  { %1876 = vmatmul.mubr.msk.f32.vlgmr.msra.gmra.mrb[14].mxu0 %vm900_vm1, %v1607_v63 }
 0xcda   :  { %v1678_v1 = vpop.f32.mrb[14].mxu0 }
 0xcdb   :  { %v1680_v5 = vpop.f32.mrb[15].mxu0 }
 0xcdc   :  { %v1685_v6 = vcombine.low %v1678_v1, %v1680_v5 }
 0xcde   :  { %v1692_v7 = vrot.slane %v1685_v6, %v2357_v12 }
 0xce0   :  { %v1694_v9 = vadd.f32 %v1692_v7, %v1608_v8 }
 0xce2   :  { %v1877_v2 = vmul.f32 -1.442695, %v1694_v9 }
 0xce4   :  { %2118 = vpow2.f32 %v1877_v2 }
 0xcee   :  { %v2119_v38 = vpop.eup %2118 }
 0xcef   :  { %v1698_v10 = vadd.f32 1.0, %v2119_v38 }
 0xcf1   :  { %2120 = vrcp.f32 %v1698_v10 }
 0xcfb   :  { %v2121_v11 = vpop.eup %2120 }
 0xcfc   :  { %v1701_v13 = vmul.f32 %v2121_v11, %v2388_v51 }
 0xcfe   :  { %v1702_v4 = vadd.f32 %v1701_v13, %v2391_v52 }
 0xd00   :  { %1714 = vrot.lane.b32.xlu1 %v1702_v4, %s2210_s4  ;;  %v1705_v14 = vrot.slane %v1702_v4, 2  ;;  %v1703_v17 = vmul.f32 %v1702_v4, %v1597_v59 }
 0xd02   :  { %v1707_v16 = vmul.f32 %v1705_v14, %v1702_v4 }
 0xd04   :  { %1709 = vrot.lane.b32.xlu0 %v1707_v16, %s2210_s4 }
 0xd72   :  { %v1715_v24 = vpop.permute.xlu1 %1714 }
 0xd73   :  { %v1716_v25 = vrot.slane %v1715_v24, 2 }
 0xd76   :  { %v1710_v18 = vpop.permute.xlu0 %1709 }
 0xd77   :  { %v1712_v21 = vadd.f32 %v1710_v18, %v1703_v17 }
 0xd79   :  { %2122 = vtanh.f32 %v1712_v21 }
 0xd83   :  { %v2123_v23 = vpop.eup %2122 }
 0xd84   :  { %1719 = vrot.lane.b32.xlu0 %v2123_v23, %s2210_s4 }
 0xdf6   :  { %v1720_v27 = vpop.permute.xlu0 %1719 }
 0xdf7   :  { %v1722_v28 = vmul.f32 %v1720_v27, %v1716_v25 }
 0xdf9   :  { %1878 = vmatmul.mubr.msk.f32.vlgmr.msra.gmra.mrb[14].mxu1 %vm900_vm1, %v1722_v28 }
 0xecc   :  { %v1793_v29 = vpop.f32.mrb[14].mxu1 }
 0xecd   :  { %v1795_v15 = vpop.f32.mrb[15].mxu1 }
 0xece   :  { %v1800_v19 = vcombine.low %v1793_v29, %v1795_v15 }
 0xed0   :  { %v1807_v20 = vrot.slane %v1800_v19, %v2357_v12 }
 0xed2   :  { %v1809_v22 = vadd.f32 %v1807_v20, %v1723_v30 }
 0xed4   :  { %v1879_v31 = vmul.f32 -1.442695, %v1809_v22 }
 0xed6   :  { %2124 = vpow2.f32 %v1879_v31 }
 0xee0   :  { %v2125_v32 = vpop.eup %2124 }
 0xee1   :  { %v1813_v33 = vadd.f32 1.0, %v2125_v32 }
 0xee3   :  { %2126 = vrcp.f32 %v1813_v33 }
 0xeed   :  { %v2127_v34 = vpop.eup %2126 }
 0xeee   :  { %v1816_v35 = vmul.f32 %v2127_v34, %v2388_v51 }
 0xef0   :  { %v1817_v36 = vadd.f32 %v1816_v35, %v2391_v52 }
 0xef2   :  { %1829 = vrot.lane.b32.xlu0 %v1817_v36, %s2210_s4  ;;  %v1820_v37 = vrot.slane %v1817_v36, 2  ;;  %v1818_v40 = vmul.f32 %v1817_v36, %v1712_v21 }
 0xef4   :  { %v1822_v39 = vmul.f32 %v1820_v37, %v1817_v36 }
 0xef6   :  { %1824 = vrot.lane.b32.xlu1 %v1822_v39, %s2210_s4 }
 0xf64   :  { %v1830_v45 = vpop.permute.xlu0 %1829 }
 0xf65   :  { %v1831_v46 = vrot.slane %v1830_v45, 2 }
 0xf68   :  { %v1825_v12 = vpop.permute.xlu1 %1824 }
 0xf69   :  { %v1827_v41 = vadd.f32 %v1825_v12, %v1818_v40 }
 0xf6b   :  { %2128 = vtanh.f32 %v1827_v41 }
 0xf75   :  { %v2129_v42 = vpop.eup %2128 }
 0xf76   :  { %1834 = vrot.lane.b32.xlu1 %v2129_v42, %s2210_s4 }
 0xfe8   :  { %v1835_v51 = vpop.permute.xlu1 %1834 }
 0xfe9   :  { %v1837_v52 = vmul.f32 %v1835_v51, %v1831_v46 }
 0xfeb   :  { %1839 = vst.msk [vmem:[#allocation8] sm:$0x3] %vm1838_vm2, %v1837_v52 }
 0xfec   :  { %2185 = shalt.err (!%p2182_p6)
}
 0xfed   :  { %s2186_s7 = scalar_lea.hbm %s2507_s5, 32 }
 0xfee   :  { %p2187_p7 = scmp.ne.s32.totalorder %s2507_s5, %s2186_s7  ;;  %p2190_p8 = scmp.lt.u32.totalorder %s2186_s7, %s2507_s5 }
 0xff0   :  { %p2192_p9 = pnand %p2190_p8, %p2187_p7 }
 0xff2   :  { %2195 = shalt.err (!%p2192_p9)
}
 0xff3   :  { %1849 = dma.vmem_to_hbm [thread:$0]  %s1847_s28, 32, %s2507_s5, [#allocation5]  }
 0xff4   :  { %2200 = dma.done.wait [#allocation5], 32  }
 0xff5   :  { %2201 = vsyncadd [#allocation5], 4294967264 }
 0xff6   :  { %1853 = vsyncpa [#allocation4], 1 }
 0xff7   :  { %1854 = vsyncpa [#allocation7], 1 }
 0xff8   :  { %1855 = vsyncpa [#allocation5], 1 }

</bundles_post_ra>
